<compile_context>
chip_gen: v7x
topology: tpu7x:2x2x1
jax: 0.10.0
libtpu: 0.0.40
codegen_flags: <defaults>
</compile_context>

<pallas_src>
import jax
import jax.numpy as jnp
from jax import lax
from jax.experimental import pallas as pl
from jax.experimental.pallas import tpu as pltpu


_SUBLANE = 8
_LANE = 128
_PALLAS_MIN_ELEMS = 2 * 1024 * 1024      # ~8 MiB of x; below this use fused XLA


def _round_up(x, m):
    return ((x + m - 1) // m) * m


def _vmem_capacity_bytes():
    try:
        return int(pltpu.get_tpu_info().vmem_capacity_bytes)
    except Exception:
        return 64 * 1024 * 1024           # conservative: v7x per-TC physical


def _choose_tiles(B, K):
    """Bytes-based, generation-aware tile sizing. Returns (tile_b, tile_k, vmem_limit)."""
    cap = _vmem_capacity_bytes()
    # Scoped VMEM we ask for: ~96 MiB on 128-MiB parts (v5e/v6e), 48 MiB on v7x.
    vmem_limit = min((cap * 3) // 4, 96 * 1024 * 1024)
    # Per pipeline buffer budget for the streamed x tile (double-buffered),
    # leaving ~4 MiB headroom for weight / output / accumulator / internal scratch.
    per_buf_bytes = min(32 * 1024 * 1024,
                        max(2 * 1024 * 1024, (vmem_limit - 4 * 1024 * 1024) // 2))
    per_buf_elems = per_buf_bytes // 4    # f32

    b_rounded = _round_up(B, _SUBLANE)
    min_rows = min(b_rounded, 256)        # want >= 256-row tiles before splitting K

    if K * min_rows <= per_buf_elems:
        # Full K fits in one block at a decent tile_b: no K split needed.
        tile_k = K
        tile_b = min(per_buf_elems // K, b_rounded)
    else:
        # Very large in_features: split K with a lane-aligned tile_k so the
        # double-buffered block stays within the (v7x-safe) budget.
        tile_b = min_rows
        tile_k = max(_LANE, ((per_buf_elems // tile_b) // _LANE) * _LANE)
        tile_k = min(tile_k, _round_up(K, _LANE))

    # Keep >= 2 batch tiles when the batch allows it, so the "parallel" axis
    # can shard across v7x's two TensorCores.
    if b_rounded >= 2 * _SUBLANE:
        tile_b = min(tile_b, _round_up(pl.cdiv(B, 2), _SUBLANE))
    tile_b = max(_SUBLANE, (tile_b // _SUBLANE) * _SUBLANE)
    return tile_b, tile_k, vmem_limit


def _make_kernel(K, tile_k):
    rem = K % tile_k   # static: nonzero only if the last K block is partial

    def kernel(x_ref, w_ref, b_ref, o_ref, acc_ref):
        # x_ref: (tile_b, tile_k) VMEM   w_ref: (tile_k, 1) VMEM
        # b_ref: (1,) SMEM               o_ref: (tile_b, 1) VMEM
        # acc_ref: (tile_b, 1) f32 VMEM scratch
        k = pl.program_id(1)
        last_k = pl.num_programs(1) - 1

        @pl.when(k == 0)
        def _init():
            acc_ref[...] = jnp.zeros_like(acc_ref)

        xb = x_ref[...]
        if rem:
            # Last K block is partial: zero its out-of-range (garbage) columns so
            # they contribute nothing (the weight column is zero-padded there).
            col = lax.broadcasted_iota(jnp.int32, xb.shape, 1)
            limit = jnp.where(k == last_k, rem, xb.shape[1])
            xb = jnp.where(col < limit, xb, 0.0)

        # MXU matvec: the MXU is otherwise idle and this keeps VPU/XLU free,
        # so compute stays fully hidden under the input DMA on every generation.
        acc_ref[...] += jnp.dot(xb, w_ref[...], preferred_element_type=jnp.float32)

        @pl.when(k == last_k)
        def _finalize():
            o_ref[...] = jnp.tanh(acc_ref[...] + b_ref[0]).astype(o_ref.dtype)

    return kernel


def masked_linear_tanh(x, weight, bias, *, tile_b=None, tile_k=None, force_pallas=False):
    """Pallas implementation of MyModel.forward.

    x:      (B, in_features) float32
    weight: (out_features, in_features) float32, out_features must be 1
            (the all-True boolean mask flattens it; see layout note above)
    bias:   (out_features,) float32
    returns (B,) float32  -- matches the PyTorch output shape
    """
    out_features, in_features = weight.shape
    assert out_features == 1, (
        "all-True boolean mask flattens the weight; F.linear is only "
        "shape-consistent when out_features == 1")
    B, K = x.shape
    assert K == in_features

    x = x.astype(jnp.float32)
    w_col = weight.reshape(K, 1).astype(jnp.float32)   # == weight[mask], as a column
    b = bias.reshape(1).astype(jnp.float32)

    # Tiny problems: pallas_call launch + pipeline prologue dominate; fused XLA wins.
    if not force_pallas and B * K < _PALLAS_MIN_ELEMS:
        return jnp.tanh(x @ w_col.reshape(K) + b)

    auto_tb, auto_tk, vmem_limit = _choose_tiles(B, K)
    if tile_b is None:
        tile_b = auto_tb
    if tile_k is None:
        tile_k = auto_tk
    tile_b = max(_SUBLANE, _round_up(int(tile_b), _SUBLANE))
    tile_b = min(tile_b, _round_up(B, _SUBLANE))
    tile_k = int(tile_k)
    assert tile_k == K or tile_k % _LANE == 0, \
        "tile_k must equal in_features or be a multiple of 128"

    grid_b = pl.cdiv(B, tile_b)
    grid_k = pl.cdiv(K, tile_k)

    # Zero-pad the (tiny) weight column so every K block of it is well-defined.
    # x itself is NOT padded (no extra HBM traffic) -- partial blocks are masked.
    k_pad = grid_k * tile_k
    if k_pad != K:
        w_col = jnp.pad(w_col, ((0, k_pad - K), (0, 0)))

    kernel = _make_kernel(K, tile_k)

    out = pl.pallas_call(
        kernel,
        out_shape=jax.ShapeDtypeStruct((B, 1), jnp.float32),
        grid=(grid_b, grid_k),
        in_specs=[
            pl.BlockSpec((tile_b, tile_k), lambda i, k: (i, k)),    # streamed x tiles
            pl.BlockSpec((tile_k, 1), lambda i, k: (k, 0)),         # weight column blocks
            pl.BlockSpec(memory_space=pltpu.MemorySpace.SMEM),      # scalar bias
        ],
        out_specs=pl.BlockSpec((tile_b, 1), lambda i, k: (i, 0)),
        scratch_shapes=[pltpu.VMEM((tile_b, 1), jnp.float32)],      # f32 accumulator
        compiler_params=pltpu.CompilerParams(
            dimension_semantics=("parallel", "arbitrary"),  # batch over v7x's 2 TCs
            vmem_limit_bytes=int(vmem_limit),
        ),
        cost_estimate=pl.CostEstimate(
            flops=2 * B * K,
            transcendentals=B,
            bytes_accessed=B * K * 4 + B * 4 + K * 4,
        ),
    )(x, w_col, b)
    return out.reshape(B)


if __name__ == "__main__":
    key = jax.random.PRNGKey(0)

    def make_problem(k, batch, in_features):
        kx, kw, kb = jax.random.split(k, 3)
        bound = 1.0 / (in_features ** 0.5)
        weight = jax.random.uniform(kw, (1, in_features), jnp.float32, -bound, bound)
        bias = jax.random.uniform(kb, (1,), jnp.float32, -bound, bound)
        x = jax.random.normal(kx, (batch, in_features), jnp.float32)
        return x, weight, bias

    def ref(x, weight, bias):
        return jnp.tanh(x @ weight.reshape(-1) + bias)

    k1, k2, k3 = jax.random.split(key, 3)

    # 1) Shipped spec size (batch=8, in_features=32): force the Pallas path.
    x1, w1, b1 = make_problem(k1, 8, 32)
    y1 = jax.block_until_ready(masked_linear_tanh(x1, w1, b1, force_pallas=True))
    assert y1.shape == (8,)
    assert jnp.allclose(y1, ref(x1, w1, b1), atol=1e-5, rtol=1e-5)

    # Small-size fallback path must agree too.
    y1f = jax.block_until_ready(masked_linear_tanh(x1, w1, b1))
    assert jnp.allclose(y1f, ref(x1, w1, b1), atol=1e-5, rtol=1e-5)

    # 2) Multi-batch-tile pipelined path, B not a multiple of tile_b (no jnp.pad:
    #    the partial last block is handled by masked block DMAs).
    x2, w2, b2 = make_problem(k2, 1000, 256)
    y2 = jax.block_until_ready(
        masked_linear_tanh(x2, w2, b2, tile_b=256, force_pallas=True))
    assert y2.shape == (1000,)
    assert jnp.allclose(y2, ref(x2, w2, b2), atol=1e-5, rtol=1e-5)

    # 3) K-split accumulator path: K not a multiple of tile_k exercises the
    #    zero-padded weight + in-kernel column mask, plus a partial batch block.
    x3, w3, b3 = make_problem(k3, 72, 300)
    y3 = jax.block_until_ready(
        masked_linear_tanh(x3, w3, b3, tile_b=32, tile_k=128, force_pallas=True))
    assert y3.shape == (72,)
    assert jnp.allclose(y3, ref(x3, w3, b3), atol=1e-5, rtol=1e-5)

    print("KERNEL_OK")
</pallas_src>

<mosaic_0001>
module attributes {stable_mosaic.version = 11 : i64} {
  func.func @kernel(%arg0: i32, %arg1: i32, %arg2: memref<8x32xf32, #tpu.memory_space<vmem>>, %arg3: memref<32x1xf32, #tpu.memory_space<vmem>>, %arg4: memref<1xf32, #tpu.memory_space<smem>>, %arg5: memref<8x1xf32, #tpu.memory_space<vmem>>, %arg6: memref<8x1xf32, #tpu.memory_space<vmem>>) attributes {dimension_semantics = [#tpu.dimension_semantics<parallel>, #tpu.dimension_semantics<arbitrary>], iteration_bounds = array<i64: 1, 1>, scalar_prefetch = 0 : i64, scratch_operands = 1 : i64, tpu.core_type = #tpu.core_type<tc>, window_params = [{transform_indices = @transform_0, window_bounds = array<i64: 8, 32>}, {transform_indices = @transform_1, window_bounds = array<i64: 32, 1>}, {transform_indices = @transform_2, window_bounds = array<i64: 1>}, {transform_indices = @transform_3, window_bounds = array<i64: 8, 1>}]} {
    %c0_i32 = arith.constant 0 : i32
    %0 = arith.cmpi eq, %arg1, %c0_i32 : i32
    %1 = arith.extui %0 : i1 to i32
    %c0_i32_0 = arith.constant 0 : i32
    %2 = arith.cmpi ne, %1, %c0_i32_0 : i32
    scf.if %2 {
      %cst_10 = arith.constant 0.000000e+00 : f32
      %12 = vector.broadcast %cst_10 : f32 to vector<8x1xf32>
      %c0_11 = arith.constant 0 : index
      %c0_12 = arith.constant 0 : index
      %13 = vector.load %arg6[%c0_11, %c0_12] : memref<8x1xf32, #tpu.memory_space<vmem>>, vector<8x1xf32>
      tpu.vector_store %arg6[%c0_11, %c0_12], %12 {strides = array<i32>} : memref<8x1xf32, #tpu.memory_space<vmem>>, vector<8x1xf32>,
    } else {
    }
    %c0 = arith.constant 0 : index
    %c0_1 = arith.constant 0 : index
    %3 = vector.load %arg2[%c0, %c0_1] : memref<8x32xf32, #tpu.memory_space<vmem>>, vector<8x32xf32>
    %c0_2 = arith.constant 0 : index
    %c0_3 = arith.constant 0 : index
    %4 = vector.load %arg6[%c0_2, %c0_3] : memref<8x1xf32, #tpu.memory_space<vmem>>, vector<8x1xf32>
    %c0_4 = arith.constant 0 : index
    %c0_5 = arith.constant 0 : index
    %5 = vector.load %arg3[%c0_4, %c0_5] : memref<32x1xf32, #tpu.memory_space<vmem>>, vector<32x1xf32>
    %cst = arith.constant dense<0.000000e+00> : vector<8x1xf32>
    %6 = tpu.matmul %3, %5, %cst {dimension_numbers = #tpu.dot_dimension_numbers<[1], [0], [0], [1], [0, 0, 1, 1], [], []>} : vector<8x32xf32>, vector<32x1xf32>, vector<8x1xf32> -> vector<8x1xf32>
    %7 = arith.addf %4, %6 : vector<8x1xf32>
    %c0_6 = arith.constant 0 : index
    %c0_7 = arith.constant 0 : index
    %8 = vector.load %arg6[%c0_6, %c0_7] : memref<8x1xf32, #tpu.memory_space<vmem>>, vector<8x1xf32>
    tpu.vector_store %arg6[%c0_6, %c0_7], %7 {strides = array<i32>} : memref<8x1xf32, #tpu.memory_space<vmem>>, vector<8x1xf32>,
    %c0_i32_8 = arith.constant 0 : i32
    %9 = arith.cmpi eq, %arg1, %c0_i32_8 : i32
    %10 = arith.extui %9 : i1 to i32
    %c0_i32_9 = arith.constant 0 : i32
    %11 = arith.cmpi ne, %10, %c0_i32_9 : i32
    scf.if %11 {
      %c0_10 = arith.constant 0 : index
      %c0_11 = arith.constant 0 : index
      %12 = vector.load %arg6[%c0_10, %c0_11] : memref<8x1xf32, #tpu.memory_space<vmem>>, vector<8x1xf32>
      %c0_12 = arith.constant 0 : index
      %13 = memref.load %arg4[%c0_12] : memref<1xf32, #tpu.memory_space<smem>>
      %14 = vector.broadcast %13 : f32 to vector<8x1xf32>
      %15 = arith.addf %12, %14 : vector<8x1xf32>
      %16 = math.tanh %15 : vector<8x1xf32>
      %c0_13 = arith.constant 0 : index
      %c0_14 = arith.constant 0 : index
      %17 = vector.load %arg5[%c0_13, %c0_14] : memref<8x1xf32, #tpu.memory_space<vmem>>, vector<8x1xf32>
      tpu.vector_store %arg5[%c0_13, %c0_14], %16 {strides = array<i32>} : memref<8x1xf32, #tpu.memory_space<vmem>>, vector<8x1xf32>,
    } else {
    }
    return
  }
  func.func @transform_0(%arg0: i32, %arg1: i32) -> (i32, i32) {
    %c0_i32 = arith.constant 0 : i32
    return %arg0, %arg1 : i32, i32
  }
  func.func @transform_1(%arg0: i32, %arg1: i32) -> (i32, i32) {
    %c0_i32 = arith.constant 0 : i32
    %c0_i32_0 = arith.constant 0 : i32
    return %arg1, %c0_i32 : i32, i32
  }
  func.func @transform_2(%arg0: i32, %arg1: i32) -> i32 {
    %c0_i32 = arith.constant 0 : i32
    %c0_i32_0 = arith.constant 0 : i32
    return %c0_i32 : i32
  }
  func.func @transform_3(%arg0: i32, %arg1: i32) -> (i32, i32) {
    %c0_i32 = arith.constant 0 : i32
    %c0_i32_0 = arith.constant 0 : i32
    return %arg0, %c0_i32 : i32, i32
  }
}

</mosaic_0001>

<bundles_post_ra>
// kernel: tpu_custom_call.1
= control target key start
LH: loop header
LB: loop body
LE: loop exit
PB: predicated region body
PF: predicated region fallthrough
CT: control target
= control target key end

     0   :  { %vm19_vm0 = vcmask 7168   ;;  %v145_v0 = vmov 0.0|0.0   ;;  %v146_v4 = vmov 0.0   ;;  %vm147_vm1 = vmmov 0   ;;  %s192_s1 = inlined_call_operand.vmem [shape: f32[32,1], index: 1, kind: input, shape index: {}]   ;;  %s193_s0 = inlined_call_operand.vmem [shape: f32[8,32], index: 0, kind: input, shape index: {}]   ;;  %s194_s2 = inlined_call_operand.<no memory space> [shape: f32[1], index: 2, kind: input, shape index: {}]   ;;  %s195_s3 = inlined_call_operand.vmem [shape: f32[8,1], index: 3, kind: output, shape index: {}]  }
   0x1   :  { %134 = vmatprep.subr.bf16.mxu0 %v145_v0  ;;  %v23_v1 = vld [vmem:[%s192_s1] sm:$0xff]  ;;  %v24_v2 = vld [vmem:[%s192_s1 + $0x8] sm:$0xff]  ;;  %v25_v3 = vld [vmem:[%s192_s1 + $0x10] sm:$0xff]  ;;  %20 = vst.msk [vmem:[#allocation2] sm:$0xff] %vm19_vm0, %v146_v4  ;;  %131 = vmatprep.mubr.msk.f32.mxu0 %vm147_vm1, %v146_v4  ;;  %vm27_vm2 = vcmask 261120   ;;  %v109_v13 = vstv %s194_s2 }
   0x2   :  { %v135_v5 = vpack.c.bf16 %v24_v2, %v23_v1  ;;  %v26_v6 = vld [vmem:[%s192_s1 + $0x18] sm:$0xff]  ;;  %v21_v8 = vld [vmem:[%s193_s0] sm:$0xff] }
   0x3   :  { %v138_v7 = vpack.c.bf16 %v26_v6, %v25_v3 }
   0x4   :  { %136 = vmatpush3.bf16.msra.mxu0 %v135_v5 }
   0x5   :  { %137 = vmatprep.subr.bf16.mxu0 %v145_v0 }
   0x8   :  { %139 = vmatpush3.bf16.msra.mxu0 %v138_v7  ;;  %v22_v9 = vld [vmem:[#allocation2] sm:$0xff] }
   0xb   :  { %132 = vmatmul.mubr.msk.f32.vlgmr.msra.gmra.mrb[0].mxu0 %vm27_vm2, %v21_v8 }
  0xde   :  { %v97_v10 = vpop.f32.mrb[0].mxu0 }
  0xdf   :  { %v101_v11 = vadd.f32 %v97_v10, %v22_v9  ;;  %v133_v12 = vpop.f32.mrb[1].mxu0 }
  0xe1   :  { %103 = vst.msk [vmem:[#allocation2] sm:$0xff] %vm19_vm0, %v101_v11 }
  0xe8   :  { %v107_v14 = vld [vmem:[#allocation2] sm:$0xff] }
  0xe9   :  { %v110_v15 = vadd.f32 %v109_v13, %v107_v14 }
  0xeb   :  { %143 = vtanh.f32 %v110_v15 }
  0xf5   :  { %v144_v16 = vpop.eup %143 }
  0xf6   :  { %112 = vst.msk [vmem:[%s195_s3] sm:$0xff] %vm19_vm0, %v144_v16 }

</bundles_post_ra>
